<compile_context>
chip_gen: v7x
topology: tpu7x:2x2x1
jax: 0.10.0
libtpu: 0.0.40
codegen_flags: <defaults>
</compile_context>

<pallas_src>
import functools

import jax
import jax.numpy as jnp
from jax import lax
from jax.experimental import pallas as pl
from jax.experimental.pallas import tpu as pltpu


def _sdpa_kernel(x_ref, wqkv_ref, bqkv_ref, o_ref, *,
                 batch, seq, hidden, apply_mask, mxu_bf16):
    x = x_ref[...]                       # (B*S, H)  f32
    w = wqkv_ref[...]                    # (H, 3H)
    b = bqkv_ref[...]                    # (1, 3H)

    if mxu_bf16:
        x_mm = x.astype(jnp.bfloat16)
        w_mm = w.astype(jnp.bfloat16)
    else:
        x_mm, w_mm = x, w

    # Single fused QKV projection, f32 accumulation, f32 bias add.
    qkv = jnp.dot(x_mm, w_mm, preferred_element_type=jnp.float32) + b  # (B*S, 3H)

    H = hidden
    q = qkv[:, 0:H] * (1.0 / hidden)     # module scales by 1/hidden (not sqrt)
    k = qkv[:, H:2 * H]
    v = qkv[:, 2 * H:3 * H]

    if apply_mask:
        row = lax.broadcasted_iota(jnp.int32, (seq, seq), 0)
        col = lax.broadcasted_iota(jnp.int32, (seq, seq), 1)
        offdiag = (row != col).astype(jnp.float32)   # 0 on diagonal, 1 elsewhere

    # Tiny static batch: unrolled per-batch attention on row slices (tile-aligned,
    # seq is a multiple of the 8-row sublane tile at these sizes -> cheap slices).
    for bi in range(batch):
        lo = bi * seq
        hi = lo + seq
        qb = q[lo:hi, :]
        kb = k[lo:hi, :]
        vb = v[lo:hi, :]

        if mxu_bf16:
            qb_mm, kb_mm = qb.astype(jnp.bfloat16), kb.astype(jnp.bfloat16)
        else:
            qb_mm, kb_mm = qb, kb

        # (S, S) scores: contract on H of both operands -- no materialized k.T.
        attn = lax.dot_general(
            qb_mm, kb_mm,
            dimension_numbers=(((1,), (1,)), ((), ())),
            preferred_element_type=jnp.float32)

        # Stable softmax; identity mask == zero the diagonal of exp (row max cancels).
        m = jnp.max(attn, axis=-1, keepdims=True)
        e = jnp.exp(attn - m)
        if apply_mask:
            e = e * offdiag
        denom = jnp.sum(e, axis=-1, keepdims=True)
        p = e * pl.reciprocal(denom, approx=True)    # EUP slot, not VALU divide

        if mxu_bf16:
            outb = jnp.dot(p.astype(jnp.bfloat16), vb.astype(jnp.bfloat16),
                           preferred_element_type=jnp.float32)
        else:
            outb = jnp.dot(p, vb, preferred_element_type=jnp.float32)

        o_ref[lo:hi, :] = outb.astype(o_ref.dtype)


def scaled_dot_product_attention(x, wq_t, bq, wk_t, bk, wv_t, bv,
                                 *, mask_identity=True, mxu_bf16=False):
    """x: (B, S, H); w*_t: (H, H) pre-transposed to (in, out); b*: (H,)."""
    B, S, H = x.shape

    # Fuse the three projections: one (H, 3H) weight, one (1, 3H) bias.
    w_qkv = jnp.concatenate([wq_t, wk_t, wv_t], axis=1)
    b_qkv = jnp.concatenate([bq, bk, bv]).reshape(1, 3 * H)
    x2d = x.reshape(B * S, H)            # free reshape; one big MXU LHS

    kernel = functools.partial(
        _sdpa_kernel,
        batch=B, seq=S, hidden=H,
        apply_mask=bool(mask_identity) and S > 1,   # S==1: mask is a softmax no-op
        mxu_bf16=mxu_bf16)

    vmem = pl.BlockSpec(memory_space=pltpu.MemorySpace.VMEM)
    out2d = pl.pallas_call(
        kernel,
        out_shape=jax.ShapeDtypeStruct((B * S, H), x.dtype),
        in_specs=[vmem, vmem, vmem],
        out_specs=vmem,
    )(x2d, w_qkv, b_qkv)

    return out2d.reshape(B, S, H)


def _reference(x, wq_t, bq, wk_t, bk, wv_t, bv, *, mask_identity=True):
    H = x.shape[-1]
    q = x @ wq_t + bq
    k = x @ wk_t + bk
    v = x @ wv_t + bv
    attn = (q / H) @ jnp.swapaxes(k, -2, -1)
    if mask_identity:
        s = attn.shape[-1]
        eye = jnp.eye(s, dtype=bool)[None]
        attn = jnp.where(eye, -jnp.finfo(attn.dtype).max, attn)
    attn = jax.nn.softmax(attn, axis=-1)
    return attn @ v


if __name__ == "__main__":
    key = jax.random.PRNGKey(0)
    B, S, H = 2, 8, 32          # batch, seq, hidden_size

    kx, kq, kbq, kk, kbk, kv, kbv = jax.random.split(key, 7)
    bound = 1.0 / (H ** 0.5)    # PyTorch nn.Linear default init range
    x = jax.random.normal(kx, (B, S, H), dtype=jnp.float32)
    wq_t = jax.random.uniform(kq, (H, H), jnp.float32, -bound, bound)
    bq = jax.random.uniform(kbq, (H,), jnp.float32, -bound, bound)
    wk_t = jax.random.uniform(kk, (H, H), jnp.float32, -bound, bound)
    bk = jax.random.uniform(kbk, (H,), jnp.float32, -bound, bound)
    wv_t = jax.random.uniform(kv, (H, H), jnp.float32, -bound, bound)
    bv = jax.random.uniform(kbv, (H,), jnp.float32, -bound, bound)

    out = scaled_dot_product_attention(x, wq_t, bq, wk_t, bk, wv_t, bv,
                                       mask_identity=True)
    out = jax.block_until_ready(out)

    ref = _reference(x, wq_t, bq, wk_t, bk, wv_t, bv, mask_identity=True)
    assert out.shape == (B, S, H)
    # Tolerance accounts for the EUP approximate-reciprocal softmax denominator.
    assert jnp.allclose(out, ref, atol=2e-3, rtol=2e-3), "mismatch vs reference"

    print("KERNEL_OK")
</pallas_src>

<mosaic_0001>
module attributes {stable_mosaic.version = 11 : i64} {
  func.func @_sdpa_kernel(%arg0: memref<16x32xf32, #tpu.memory_space<vmem>>, %arg1: memref<32x96xf32, #tpu.memory_space<vmem>>, %arg2: memref<1x96xf32, #tpu.memory_space<vmem>>, %arg3: memref<16x32xf32, #tpu.memory_space<vmem>>) attributes {dimension_semantics = [], scalar_prefetch = 0 : i64, scratch_operands = 0 : i64, tpu.core_type = #tpu.core_type<tc>} {
    %c0 = arith.constant 0 : index
    %c0_0 = arith.constant 0 : index
    %0 = vector.load %arg0[%c0, %c0_0] : memref<16x32xf32, #tpu.memory_space<vmem>>, vector<16x32xf32>
    %c0_1 = arith.constant 0 : index
    %c0_2 = arith.constant 0 : index
    %1 = vector.load %arg1[%c0_1, %c0_2] : memref<32x96xf32, #tpu.memory_space<vmem>>, vector<32x96xf32>
    %c0_3 = arith.constant 0 : index
    %c0_4 = arith.constant 0 : index
    %2 = vector.load %arg2[%c0_3, %c0_4] : memref<1x96xf32, #tpu.memory_space<vmem>>, vector<1x96xf32>
    %cst = arith.constant dense<0.000000e+00> : vector<16x96xf32>
    %3 = tpu.matmul %0, %1, %cst {dimension_numbers = #tpu.dot_dimension_numbers<[1], [0], [0], [1], [0, 0, 1, 1], [], []>} : vector<16x32xf32>, vector<32x96xf32>, vector<16x96xf32> -> vector<16x96xf32>
    %4 = vector.broadcast %2 : vector<1x96xf32> to vector<16x96xf32>
    %5 = arith.addf %3, %4 : vector<16x96xf32>
    %6 = vector.extract_strided_slice %5 {offsets = [0, 0], sizes = [16, 32], strides = [1, 1]} : vector<16x96xf32> to vector<16x32xf32>
    %cst_5 = arith.constant 3.125000e-02 : f32
    %7 = vector.broadcast %cst_5 : f32 to vector<16x32xf32>
    %8 = arith.mulf %6, %7 : vector<16x32xf32>
    %9 = vector.extract_strided_slice %5 {offsets = [0, 32], sizes = [16, 32], strides = [1, 1]} : vector<16x96xf32> to vector<16x32xf32>
    %10 = vector.extract_strided_slice %5 {offsets = [0, 64], sizes = [16, 32], strides = [1, 1]} : vector<16x96xf32> to vector<16x32xf32>
    %11 = tpu.iota {dimensions = array<i32: 0>} : vector<8x8xi32>
    %12 = tpu.iota {dimensions = array<i32: 1>} : vector<8x8xi32>
    %13 = arith.cmpi ne, %11, %12 : vector<8x8xi32>
    %14 = arith.extui %13 : vector<8x8xi1> to vector<8x8xi32>
    %15 = arith.sitofp %14 : vector<8x8xi32> to vector<8x8xf32>
    %16 = vector.extract_strided_slice %8 {offsets = [0, 0], sizes = [8, 32], strides = [1, 1]} : vector<16x32xf32> to vector<8x32xf32>
    %17 = vector.extract_strided_slice %9 {offsets = [0, 0], sizes = [8, 32], strides = [1, 1]} : vector<16x32xf32> to vector<8x32xf32>
    %18 = vector.extract_strided_slice %10 {offsets = [0, 0], sizes = [8, 32], strides = [1, 1]} : vector<16x32xf32> to vector<8x32xf32>
    %cst_6 = arith.constant dense<0.000000e+00> : vector<8x8xf32>
    %19 = tpu.matmul %16, %17, %cst_6 {dimension_numbers = #tpu.dot_dimension_numbers<[1], [1], [0], [0], [0, 0, 1, 0], [], []>} : vector<8x32xf32>, vector<8x32xf32>, vector<8x8xf32> -> vector<8x8xf32>
    %cst_7 = arith.constant dense<0xFF800000> : vector<8xf32>
    %20 = vector.multi_reduction <maximumf>, %19, %cst_7 [1] : vector<8x8xf32> to vector<8xf32>
    %21 = vector.shape_cast %20 : vector<8xf32> to vector<8x1xf32>
    %22 = vector.broadcast %21 : vector<8x1xf32> to vector<8x8xf32>
    %23 = arith.subf %19, %22 : vector<8x8xf32>
    %24 = math.exp %23 : vector<8x8xf32>
    %25 = arith.mulf %24, %15 : vector<8x8xf32>
    %cst_8 = arith.constant dense<0.000000e+00> : vector<8xf32>
    %26 = vector.multi_reduction <add>, %25, %cst_8 [1] : vector<8x8xf32> to vector<8xf32>
    %27 = vector.shape_cast %26 : vector<8xf32> to vector<8x1xf32>
    %28 = tpu.reciprocal %27 {approx = true} : vector<8x1xf32> -> vector<8x1xf32>
    %29 = vector.broadcast %28 : vector<8x1xf32> to vector<8x8xf32>
    %30 = arith.mulf %25, %29 : vector<8x8xf32>
    %cst_9 = arith.constant dense<0.000000e+00> : vector<8x32xf32>
    %31 = tpu.matmul %30, %18, %cst_9 {dimension_numbers = #tpu.dot_dimension_numbers<[1], [0], [0], [1], [0, 0, 1, 1], [], []>} : vector<8x8xf32>, vector<8x32xf32>, vector<8x32xf32> -> vector<8x32xf32>
    %c0_10 = arith.constant 0 : index
    %c0_11 = arith.constant 0 : index
    %32 = vector.load %arg3[%c0_10, %c0_11] : memref<16x32xf32, #tpu.memory_space<vmem>>, vector<8x32xf32>
    tpu.vector_store %arg3[%c0_10, %c0_11], %31 {strides = array<i32>} : memref<16x32xf32, #tpu.memory_space<vmem>>, vector<8x32xf32>,
    %33 = vector.extract_strided_slice %8 {offsets = [8, 0], sizes = [8, 32], strides = [1, 1]} : vector<16x32xf32> to vector<8x32xf32>
    %34 = vector.extract_strided_slice %9 {offsets = [8, 0], sizes = [8, 32], strides = [1, 1]} : vector<16x32xf32> to vector<8x32xf32>
    %35 = vector.extract_strided_slice %10 {offsets = [8, 0], sizes = [8, 32], strides = [1, 1]} : vector<16x32xf32> to vector<8x32xf32>
    %cst_12 = arith.constant dense<0.000000e+00> : vector<8x8xf32>
    %36 = tpu.matmul %33, %34, %cst_12 {dimension_numbers = #tpu.dot_dimension_numbers<[1], [1], [0], [0], [0, 0, 1, 0], [], []>} : vector<8x32xf32>, vector<8x32xf32>, vector<8x8xf32> -> vector<8x8xf32>
    %cst_13 = arith.constant dense<0xFF800000> : vector<8xf32>
    %37 = vector.multi_reduction <maximumf>, %36, %cst_13 [1] : vector<8x8xf32> to vector<8xf32>
    %38 = vector.shape_cast %37 : vector<8xf32> to vector<8x1xf32>
    %39 = vector.broadcast %38 : vector<8x1xf32> to vector<8x8xf32>
    %40 = arith.subf %36, %39 : vector<8x8xf32>
    %41 = math.exp %40 : vector<8x8xf32>
    %42 = arith.mulf %41, %15 : vector<8x8xf32>
    %cst_14 = arith.constant dense<0.000000e+00> : vector<8xf32>
    %43 = vector.multi_reduction <add>, %42, %cst_14 [1] : vector<8x8xf32> to vector<8xf32>
    %44 = vector.shape_cast %43 : vector<8xf32> to vector<8x1xf32>
    %45 = tpu.reciprocal %44 {approx = true} : vector<8x1xf32> -> vector<8x1xf32>
    %46 = vector.broadcast %45 : vector<8x1xf32> to vector<8x8xf32>
    %47 = arith.mulf %42, %46 : vector<8x8xf32>
    %cst_15 = arith.constant dense<0.000000e+00> : vector<8x32xf32>
    %48 = tpu.matmul %47, %35, %cst_15 {dimension_numbers = #tpu.dot_dimension_numbers<[1], [0], [0], [1], [0, 0, 1, 1], [], []>} : vector<8x8xf32>, vector<8x32xf32>, vector<8x32xf32> -> vector<8x32xf32>
    %c8 = arith.constant 8 : index
    %c0_16 = arith.constant 0 : index
    %49 = vector.load %arg3[%c8, %c0_16] : memref<16x32xf32, #tpu.memory_space<vmem>>, vector<8x32xf32>
    tpu.vector_store %arg3[%c8, %c0_16], %48 {strides = array<i32>} : memref<16x32xf32, #tpu.memory_space<vmem>>, vector<8x32xf32>,
    return
  }
}

</mosaic_0001>

<bundles_post_ra>
// kernel: tpu_custom_call.1
= control target key start
LH: loop header
LB: loop body
LE: loop exit
PB: predicated region body
PF: predicated region fallthrough
CT: control target
= control target key end

     0   :  { %8 = vsyncpa [#allocation3], 0  ;;  %s756_s0 = inlined_call_operand.hbm [shape: f32[16,32], index: 0, kind: input, shape index: {}]   ;;  %s757_s1 = inlined_call_operand.hbm [shape: f32[32,96], index: 1, kind: input, shape index: {}]   ;;  %s758_s2 = inlined_call_operand.vmem [shape: f32[1,96], index: 2, kind: input, shape index: {}]   ;;  %s759_s3 = inlined_call_operand.hbm [shape: f32[16,32], index: 3, kind: output, shape index: {}]  }
   0x1   :  { %9 = vsyncpa [#allocation6], 0 }
   0x2   :  { %10 = vsyncpa [#allocation4], 0  ;;  %s652_s12 = smov [#allocation2]   ;;  %s580_s16 = scalar_lea.hbm %s756_s0, 256 }
   0x3   :  { %s16_s13 = sshll.u32 %s652_s12, 4  ;;  %p581_p0 = scmp.ne.s32.totalorder %s756_s0, %s580_s16  ;;  %s17_s13 = int_to_ptr.vmem [resolvable:$true] %s16_s13 }
   0x4   :  { %p584_p1 = scmp.lt.u32.totalorder %s580_s16, %s756_s0 }
   0x6   :  { %p586_p2 = pnand %p584_p1, %p581_p0 }
   0x8   :  { %589 = shalt.err (!%p586_p2)
}
   0x9   :  { %s590_s21 = scalar_lea.vmem %s17_s13, 256  ;;  %p595_p4 = scmp.lt.s32.totalorder %s17_s13, %s17_s13 }
   0xa   :  { %p591_p3 = scmp.ne.s32.totalorder %s17_s13, %s590_s21  ;;  %p596_p5 = scmp.lt.s32.totalorder %s590_s21, %s590_s21 }
   0xc   :  { %p597_p6 = por %p596_p5, %p595_p4 }
   0xe   :  { %p598_p7 = pnand %p597_p6, %p591_p3 }
  0x10   :  { %601 = shalt.err (!%p598_p7)
}
  0x11   :  { %s653_s22 = smov 128   ;;  %s654_s23 = smov 8  }
  0x12   :  { %22 = dma.hbm_to_vmem [thread:$0]  %s756_s0, 256, %s17_s13, [#allocation3], %s653_s22, %s653_s22, %s654_s23  }
  0x13   :  { %s655_s26 = smov [#allocation5]   ;;  %s602_s30 = scalar_lea.hbm %s757_s1, 512 }
  0x14   :  { %s28_s27 = sshll.u32 %s655_s26, 4  ;;  %p603_p8 = scmp.ne.s32.totalorder %s757_s1, %s602_s30  ;;  %s29_s27 = int_to_ptr.vmem [resolvable:$true] %s28_s27 }
  0x15   :  { %p606_p9 = scmp.lt.u32.totalorder %s602_s30, %s757_s1 }
  0x17   :  { %p608_p10 = pnand %p606_p9, %p603_p8 }
  0x19   :  { %611 = shalt.err (!%p608_p10)
}
  0x1a   :  { %s612_s8 = scalar_lea.vmem %s29_s27, 512  ;;  %p617_p12 = scmp.lt.s32.totalorder %s29_s27, %s29_s27 }
  0x1b   :  { %p613_p11 = scmp.ne.s32.totalorder %s29_s27, %s612_s8  ;;  %p618_p13 = scmp.lt.s32.totalorder %s612_s8, %s612_s8 }
  0x1d   :  { %p619_p0 = por %p618_p13, %p617_p12 }
  0x1f   :  { %p620_p1 = pnand %p619_p0, %p613_p11 }
  0x21   :  { %623 = shalt.err (!%p620_p1)
}
  0x22   :  { %34 = dma.hbm_to_vmem [thread:$0]  %s757_s1, 512, %s29_s27, [#allocation6], %s653_s22, %s653_s22, %s654_s23  }
  0x23   :  { %646 = dma.done.wait [#allocation3], 256  }
  0x24   :  { %647 = vsyncadd [#allocation3], 4294967040 }
  0x25   :  { %648 = dma.done.wait [#allocation6], 512  }
  0x26   :  { %649 = vsyncadd [#allocation6], 4294966784  ;;  %vm56_vm0 = vcmask 261120   ;;  %v45_v0 = vld [vmem:[#allocation5] sm:$0xff]  ;;  %v46_v1 = vld [vmem:[#allocation5 + $0x8] sm:$0xff]  ;;  %v656_v8 = vmov 0.0   ;;  %v140_v26 = vlaneseq }
  0x27   :  { %v47_v2 = vld [vmem:[#allocation5 + $0x10] sm:$0xff]  ;;  %v555_v3 = vpack.c.bf16 %v46_v1, %v45_v0  ;;  %v48_v4 = vld [vmem:[#allocation5 + $0x18] sm:$0xff]  ;;  %535 = vmatprep.subr.mxu1 %v656_v8  ;;  %vm657_vm1 = vmmov 0   ;;  %s658_s11 = smov 96   ;;  %vm225_vm2 = vcmask 64512   ;;  %s660_s12 = smov [#allocation7]  }
  0x28   :  { %v43_v5 = vld [vmem:[#allocation2] sm:$0xff]  ;;  %v559_v6 = vpack.c.bf16 %v48_v4, %v47_v2  ;;  %v44_v7 = vld [vmem:[#allocation2 + $0x8] sm:$0xff]  ;;  %537 = vmatprep.mubr.msk.f32.mxu1 %vm657_vm1, %v656_v8  ;;  %v141_v30 = vshrl.u32 %v140_v26, 7  ;;  %v143_v31 = vand.u32 127, %v140_v26  ;;  %s487_s13 = sshll.u32 %s660_s12, 4  ;;  %s488_s13 = int_to_ptr.vmem [resolvable:$true] %s487_s13 }
  0x29   :  { %532 = vmatprep.mubr.msk.f32.mxu0 %vm56_vm0, %v43_v5  ;;  %556 = vmatprep.subr.bf16.mxu0 %v555_v3  ;;  %v500_v9 = vld [vmem:[%s758_s2] ss:$0 sm:$0xff]  ;;  %s659_s2 = smov 64   ;;  %s624_s14 = scalar_lea.vmem %s488_s13, 256 }
  0x2a   :  { %558 = vmatpush3.bf16.msra.mxu0 %v555_v3  ;;  %vm144_vm3 = vcmp.ne.s32.totalorder %v141_v30, %v143_v31  ;;  %p625_p2 = scmp.ne.s32.totalorder %s488_s13, %s624_s14  ;;  %p629_p3 = scmp.lt.s32.totalorder %s488_s13, %s488_s13 }
  0x2b   :  { %560 = vmatprep.subr.bf16.mxu0 %v559_v6  ;;  %v503_v33 = vsel %vm144_vm3, 1.0, %v656_v8  ;;  %p630_p4 = scmp.lt.s32.totalorder %s624_s14, %s624_s14 }
  0x2d   :  { %p631_p5 = por %p630_p4, %p629_p3 }
  0x2e   :  { %562 = vmatpush3.bf16.msra.mxu0 %v559_v6 }
  0x2f   :  { %545 = vmatprep.subr.mxu0 %v656_v8  ;;  %p632_p6 = pnand %p631_p5, %p625_p2 }
  0x31   :  { %533 = vmatmul.mubr.msk.f32.vlgmr.msra.gmra.mrb[0].mxu0 %vm56_vm0, %v44_v7 }
  0x32   :  { %547 = vmatprep.mubr.msk.f32.mxu0 %vm657_vm1, %v656_v8 }
 0x104   :  { %v534_v10 = vpop.f32.mrb[0].mxu0 }
 0x105   :  { %v129_v11 = vpop.f32.mrb[1].mxu0  ;;  %v135_v13 = vadd.f32 %v534_v10, %v500_v9 }
 0x106   :  { %v130_v12 = vadd.f32 %v500_v9, %v129_v11 }
 0x107   :  { %v139_v17 = vmul.f32 0.03125, %v135_v13 }
 0x108   :  { %148 = vrot.lane.b32.xlu0 %v130_v12, %s658_s11  ;;  %v138_v15 = vmul.f32 0.03125, %v130_v12 }
 0x10c   :  { %316 = vrot.lane.b32.xlu0 %v135_v13, %s658_s11 }
 0x17a   :  { %v149_v14 = vpop.permute.xlu0 %148 }
 0x17b   :  { %536 = vmatpush3.xpose.msk.msra.mxu1 %vm56_vm0, %v149_v14 }
 0x17c   :  { %540 = vmatprep.subr.mxu1 %v656_v8 }
 0x17e   :  { %v317_v16 = vpop.permute.xlu0 %316  ;;  %538 = vmatmul.mubr.msk.f32.vlgmr.msra.gmra.mrb[0].mxu1 %vm56_vm0, %v138_v15 }
 0x17f   :  { %546 = vmatpush3.xpose.msk.msra.mxu0 %vm56_vm0, %v317_v16  ;;  %542 = vmatprep.mubr.msk.f32.mxu1 %vm657_vm1, %v656_v8 }
 0x182   :  { %548 = vmatmul.mubr.msk.f32.vlgmr.msra.gmra.mrb[2].mxu0 %vm56_vm0, %v139_v17 }
 0x251   :  { %v221_v18 = vpop.f32.mrb[0].mxu1 }
 0x252   :  { %v539_v19 = vpop.f32.mrb[1].mxu1  ;;  %v226_v20 = vsel %vm225_vm2, %v221_v18, -inf }
 0x253   :  { %227 = vmax.xlane.f32.xlu1 %v226_v20 }
 0x255   :  { %v389_v21 = vpop.f32.mrb[2].mxu0 }
 0x256   :  { %v549_v22 = vpop.f32.mrb[3].mxu0  ;;  %v393_v23 = vsel %vm225_vm2, %v389_v21, -inf }
 0x257   :  { %394 = vmax.xlane.f32.xlu1 %v393_v23 }
 0x2e0   :  { %v228_v24 = vpop.xlane.xlu1 %227 }
 0x2e1   :  { %v229_v25 = vsub.f32 %v221_v18, %v228_v24 }
 0x2e3   :  { %v230_v27 = vmul.f32 1.442695, %v229_v25 }
 0x2e4   :  { %v395_v28 = vpop.xlane.xlu1 %394 }
 0x2e5   :  { %572 = vpow2.f32 %v230_v27  ;;  %v396_v29 = vsub.f32 %v389_v21, %v395_v28 }
 0x2e7   :  { %v397_v32 = vmul.f32 1.442695, %v396_v29 }
 0x2e9   :  { %574 = vpow2.f32 %v397_v32 }
 0x2ef   :  { %v573_v34 = vpop.eup %572 }
 0x2f0   :  { %v232_v35 = vmul.f32 %v573_v34, %v503_v33 }
 0x2f2   :  { %v233_v36 = vsel %vm225_vm2, %v232_v35, 0.0 }
 0x2f3   :  { %v575_v37 = vpop.eup %574  ;;  %234 = vadd.xlane.f32.xlu0 %v233_v36 }
 0x2f4   :  { %v399_v38 = vmul.f32 %v575_v37, %v503_v33 }
 0x2f6   :  { %v400_v39 = vsel %vm225_vm2, %v399_v38, 0.0 }
 0x2f7   :  { %401 = vadd.xlane.f32.xlu1 %v400_v39 }
 0x308   :  { %238 = vrot.lane.b32.xlu1 %v130_v12, %s659_s2 }
 0x30c   :  { %405 = vrot.lane.b32.xlu1 %v135_v13, %s659_s2 }
 0x380   :  { %v235_v40 = vpop.xlane.xlu0 %234 }
 0x381   :  { %576 = vrcp.f32 %v235_v40 }
 0x384   :  { %v402_v41 = vpop.xlane.xlu1 %401 }
 0x385   :  { %578 = vrcp.f32 %v402_v41 }
 0x388   :  { %v239_v42 = vpop.permute.xlu1 %238 }
 0x389   :  { %541 = vmatpush3.msra.mxu1 %v239_v42 }
 0x38a   :  { %550 = vmatprep.subr.mxu1 %v656_v8 }
 0x38b   :  { %v577_v43 = vpop.eup %576 }
 0x38c   :  { %v237_v44 = vmul.f32 %v577_v43, %v232_v35  ;;  %v406_v45 = vpop.permute.xlu1 %405 }
 0x38e   :  { %543 = vmatmul.mubr.msk.f32.vlgmr.msra.gmra.mrb[2].mxu1 %vm225_vm2, %v237_v44 }
 0x38f   :  { %v579_v46 = vpop.eup %578  ;;  %551 = vmatpush3.msra.mxu1 %v406_v45  ;;  %552 = vmatprep.mubr.msk.f32.mxu1 %vm657_vm1, %v656_v8 }
 0x390   :  { %v404_v47 = vmul.f32 %v579_v46, %v399_v38 }
 0x392   :  { %553 = vmatmul.mubr.msk.f32.vlgmr.msra.gmra.mrb[4].mxu1 %vm225_vm2, %v404_v47 }
 0x461   :  { %v310_v48 = vpop.f32.mrb[2].mxu1 }
 0x462   :  { %314 = vst.msk [vmem:[#allocation7] sm:$0xff] %vm56_vm0, %v310_v48  ;;  %v544_v49 = vpop.f32.mrb[3].mxu1 }
 0x465   :  { %v477_v50 = vpop.f32.mrb[4].mxu1 }
 0x466   :  { %481 = vst.msk [vmem:[#allocation7 + $0x8] sm:$0xff] %vm56_vm0, %v477_v50  ;;  %v554_v51 = vpop.f32.mrb[5].mxu1 }
 0x467   :  { %635 = shalt.err (!%p632_p6)
}
 0x468   :  { %s636_s17 = scalar_lea.hbm %s759_s3, 256 }
 0x469   :  { %p637_p7 = scmp.ne.s32.totalorder %s759_s3, %s636_s17  ;;  %p640_p8 = scmp.lt.u32.totalorder %s636_s17, %s759_s3 }
 0x46b   :  { %p642_p9 = pnand %p640_p8, %p637_p7 }
 0x46d   :  { %645 = shalt.err (!%p642_p9)
}
 0x46e   :  { %493 = dma.vmem_to_hbm [thread:$0]  %s488_s13, 256, %s759_s3, [#allocation4], %s653_s22, %s653_s22, %s654_s23  }
 0x46f   :  { %650 = dma.done.wait [#allocation4], 256  }
 0x470   :  { %651 = vsyncadd [#allocation4], 4294967040 }
 0x471   :  { %497 = vsyncpa [#allocation3], 1 }
 0x472   :  { %498 = vsyncpa [#allocation6], 1 }
 0x473   :  { %499 = vsyncpa [#allocation4], 1 }

</bundles_post_ra>
